<compile_context>
chip_gen: v6e
topology: v6e:2x2x1
jax: 0.10.0
libtpu: 0.0.40
codegen_flags: <defaults>
</compile_context>

<pallas_src>
import functools

import jax
import jax.numpy as jnp
from jax.experimental import pallas as pl
from jax.experimental.pallas import tpu as pltpu


def _round_up(x, m):
    return (x + m - 1) // m * m


def _malconv_kernel(patches_ref, wconv_ref, bconv_ref, out_ref, acc_ref, *,
                    t_blk, t_valid, tiles_per_split):
    s = pl.program_id(0)          # time-split index
    t = pl.program_id(2)          # time-tile index within the split

    @pl.when(t == 0)
    def _init():
        acc_ref[...] = jnp.full(acc_ref.shape, -jnp.inf, jnp.float32)

    # Fused conv1+conv2: one (t_blk, K) @ (K, 256) bf16 MXU pass, f32 acc.
    c = jnp.dot(patches_ref[...], wconv_ref[...],
                preferred_element_type=jnp.float32) + bconv_ref[...]
    n_out = acc_ref.shape[1]                           # 128
    c1 = c[:, :n_out]
    c2 = c[:, n_out:]
    # sigmoid(c2) = 1/(1+exp(-c2)); exp and approx reciprocal both go to the
    # EUP slot, keeping the VALU free of divides.
    attn = pl.reciprocal(1.0 + jnp.exp(-c2), approx=True)
    gated = jnp.maximum(c1 * attn, 0.0)                # (t_blk, 128) f32

    # Running global max-pool.  Row masking is predicated to tiles that
    # overhang the valid time range; full tiles skip iota/compare/select.
    valid = t_valid - (s * tiles_per_split + t) * t_blk   # scalar: valid rows

    @pl.when(valid >= t_blk)
    def _full_tile():
        acc_ref[...] = jnp.maximum(acc_ref[...],
                                   jnp.max(gated, axis=0, keepdims=True))

    @pl.when(valid < t_blk)
    def _partial_tile():
        row = jax.lax.broadcasted_iota(jnp.int32, (t_blk, 1), 0)
        g = jnp.where(row < valid, gated, -jnp.inf)
        acc_ref[...] = jnp.maximum(acc_ref[...],
                                   jnp.max(g, axis=0, keepdims=True))

    @pl.when(t == pl.num_programs(2) - 1)
    def _finalize():
        # Lane-dense (1, 1, 8, 128) slab write of this split's partial max.
        out_ref[...] = jnp.broadcast_to(acc_ref[...][:, None, None, :],
                                        out_ref.shape)


@functools.partial(jax.jit, static_argnames=("win_size", "t_blk", "n_split"))
def malconv_forward(x_tokens, params, *, win_size, t_blk=512, n_split=2):
    """x_tokens: int32 (B, L).  Returns sigmoid output of shape (B, 1)."""
    emb_tab = params["embedding"]                      # (vocab, 8)
    w1, b1 = params["conv1_w"], params["conv1_b"]      # (128, 8, win), (128,)
    w2, b2 = params["conv2_w"], params["conv2_b"]
    wd1, bd1 = params["dense1_w"], params["dense1_b"]  # (64, 128), (64,)
    wd2, bd2 = params["dense2_w"], params["dense2_b"]  # (1, 64), (1,)

    B, L = x_tokens.shape
    vocab, emb_dim = emb_tab.shape
    conv_ch = w1.shape[0]                              # 128
    pad = (win_size - 1) // 2

    # ---- glue: embedding lookup + disjoint-window patch extraction (bf16) ----
    # stride == kernel_size, so "patches" is a contiguous reshape of the padded
    # embedded sequence (no duplication).  Conv zero padding is applied to the
    # *tokens* (extra all-zeros vocab row), so the gather -> reshape chain is a
    # single bf16 producer with no extra full-size padded HBM copy.
    emb_ext = jnp.concatenate(
        [emb_tab, jnp.zeros((1, emb_dim), emb_tab.dtype)], axis=0
    ).astype(jnp.bfloat16)                             # (vocab+1, emb)
    tok_pad = jnp.pad(x_tokens, ((0, 0), (pad, pad)), constant_values=vocab)
    Lp = L + 2 * pad
    T = (Lp - win_size) // win_size + 1                # Conv1d output length
    K = win_size * emb_dim
    patches = jnp.take(emb_ext, tok_pad[:, : T * win_size], axis=0)
    patches = patches.reshape(B, T, K)                 # (B, T, K) bf16

    # ---- tiling: keep at least n_split time tiles so the split axis has work --
    t_blk = max(16, min(_round_up(t_blk, 16),
                        _round_up(pl.cdiv(T, max(1, n_split)), 16)))
    total_tiles = pl.cdiv(T, t_blk)
    n_split = max(1, min(n_split, total_tiles))
    tps = pl.cdiv(total_tiles, n_split)                # time tiles per split
    last_tile = total_tiles - 1

    # ---- weight prep: fused conv RHS (K, 256) bf16 + (1, 256) f32 bias ----
    def conv_w_t(w):   # (out, in, k) -> (k*in, out), matching patch flattening
        return jnp.transpose(w, (2, 1, 0)).reshape(K, conv_ch)

    wconv = jnp.concatenate([conv_w_t(w1), conv_w_t(w2)], axis=1)
    wconv = wconv.astype(jnp.bfloat16)                 # (K, 256)
    bconv = jnp.concatenate([b1, b2]).reshape(1, 2 * conv_ch).astype(jnp.float32)

    grid = (n_split, B, tps)

    pooled_slab = pl.pallas_call(
        functools.partial(_malconv_kernel, t_blk=t_blk, t_valid=T,
                          tiles_per_split=tps),
        out_shape=jax.ShapeDtypeStruct((B, n_split, 8, conv_ch), jnp.float32),
        grid_spec=pltpu.PrefetchScalarGridSpec(
            num_scalar_prefetch=0,
            grid=grid,
            in_specs=[
                # Streaming patches: batch squeezed, tiled over time; clamp the
                # tile index so overhanging tiles re-read the last valid block
                # (their rows are masked to -inf in-kernel).
                pl.BlockSpec(
                    (pl.Squeezed(), t_blk, K),
                    lambda s, b, t: (b, jnp.minimum(s * tps + t, last_tile), 0)),
                # Resident weights / bias: constant index maps.
                pl.BlockSpec((K, 2 * conv_ch), lambda s, b, t: (0, 0)),
                pl.BlockSpec((1, 2 * conv_ch), lambda s, b, t: (0, 0)),
            ],
            out_specs=pl.BlockSpec((1, 1, 8, conv_ch),
                                   lambda s, b, t: (b, s, 0, 0)),
            scratch_shapes=[pltpu.VMEM((1, conv_ch), jnp.float32)],
        ),
        compiler_params=pltpu.CompilerParams(
            # split/batch parallel (v7x megacore gets time-parallel work even at
            # B=1); time-reduction axis arbitrary.  32 MiB covers the ~13 MiB
            # production working set on every generation (v5e default is 16).
            dimension_semantics=("parallel", "parallel", "arbitrary"),
            vmem_limit_bytes=32 * 1024 * 1024),
    )(patches, wconv, bconv)

    # ---- tiny f32 head on the combined pooled vector (exactly the PyTorch spec) --
    pooled = jnp.max(pooled_slab[:, :, 0, :], axis=1)  # (B, 128) global max-pool
    d = pooled @ wd1.T + bd1                           # dense1 (no activation)
    return jax.nn.sigmoid(d @ wd2.T + bd2)             # dense2 + sigmoid: (B, 1)


def init_params(key, *, vocab_size=256, emb_dim=8, win_size=8,
                conv_ch=128, hidden=64):
    ks = jax.random.split(key, 9)
    s = 0.05
    return {
        "embedding": jax.random.normal(ks[0], (vocab_size, emb_dim), jnp.float32) * s,
        "conv1_w": jax.random.normal(ks[1], (conv_ch, emb_dim, win_size), jnp.float32) * s,
        "conv1_b": jax.random.normal(ks[2], (conv_ch,), jnp.float32) * s,
        "conv2_w": jax.random.normal(ks[3], (conv_ch, emb_dim, win_size), jnp.float32) * s,
        "conv2_b": jax.random.normal(ks[4], (conv_ch,), jnp.float32) * s,
        "dense1_w": jax.random.normal(ks[5], (hidden, conv_ch), jnp.float32) * s,
        "dense1_b": jax.random.normal(ks[6], (hidden,), jnp.float32) * s,
        "dense2_w": jax.random.normal(ks[7], (1, hidden), jnp.float32) * s,
        "dense2_b": jax.random.normal(ks[8], (1,), jnp.float32) * s,
    }


def malconv_reference(x_tokens, params, *, win_size):
    """Pure-JAX f32 reference mirroring the PyTorch forward (NCW conv)."""
    emb = jnp.take(params["embedding"], x_tokens, axis=0)      # (B, L, 8)
    x = jnp.transpose(emb, (0, 2, 1))                          # (B, 8, L)
    pad = (win_size - 1) // 2

    def conv(x_ncw, w, b):
        y = jax.lax.conv_general_dilated(
            x_ncw, w, window_strides=(win_size,), padding=[(pad, pad)],
            dimension_numbers=("NCH", "OIH", "NCH"))
        return y + b[None, :, None]

    c1 = conv(x, params["conv1_w"], params["conv1_b"])
    c2 = conv(x, params["conv2_w"], params["conv2_b"])
    relu_out = jnp.maximum(c1 * jax.nn.sigmoid(c2), 0.0)       # (B, 128, T)
    pooled = jnp.max(relu_out, axis=-1)                        # (B, 128)
    d = pooled @ params["dense1_w"].T + params["dense1_b"]
    return jax.nn.sigmoid(d @ params["dense2_w"].T + params["dense2_b"])


if __name__ == "__main__":
    # Small shapes consistent with the module: window 8, vocab 256, emb 8.
    # L=230 gives T=29 conv windows -> 2 time tiles at t_blk=16, so the time
    # split (one tile per split), the full-tile fast path, and the predicated
    # partial-tile mask are all exercised.
    B, L, WIN, VOCAB = 2, 230, 8, 256
    key = jax.random.PRNGKey(0)
    k_tok, k_par = jax.random.split(key)
    x = jax.random.randint(k_tok, (B, L), 0, VOCAB, dtype=jnp.int32)
    params = init_params(k_par, vocab_size=VOCAB, win_size=WIN)

    out = jax.block_until_ready(
        malconv_forward(x, params, win_size=WIN, t_blk=16, n_split=2))
    ref = jax.block_until_ready(malconv_reference(x, params, win_size=WIN))

    assert out.shape == (B, 1)
    assert jnp.allclose(out, ref, atol=1e-2, rtol=1e-2), (out, ref)
    print("KERNEL_OK")
</pallas_src>

<mosaic_0001>
module attributes {stable_mosaic.version = 11 : i64} {
  func.func @_malconv_kernel(%arg0: i32, %arg1: i32, %arg2: i32, %arg3: memref<1x16x64xbf16, #tpu.memory_space<vmem>>, %arg4: memref<64x256xbf16, #tpu.memory_space<vmem>>, %arg5: memref<1x256xf32, #tpu.memory_space<vmem>>, %arg6: memref<1x1x8x128xf32, #tpu.memory_space<vmem>>, %arg7: memref<1x128xf32, #tpu.memory_space<vmem>>) attributes {dimension_semantics = [#tpu.dimension_semantics<parallel>, #tpu.dimension_semantics<parallel>, #tpu.dimension_semantics<arbitrary>], iteration_bounds = array<i64: 2, 2, 1>, scalar_prefetch = 0 : i64, scratch_operands = 1 : i64, tpu.core_type = #tpu.core_type<tc>, window_params = [{transform_indices = @transform_0, window_bounds = array<i64: 1, 16, 64>}, {pipeline_mode = #tpu.pipeline_mode<synchronous>, transform_indices = @transform_1, window_bounds = array<i64: 64, 256>}, {pipeline_mode = #tpu.pipeline_mode<synchronous>, transform_indices = @transform_2, window_bounds = array<i64: 1, 256>}, {transform_indices = @transform_3, window_bounds = array<i64: 1, 1, 8, 128>}]} {
    %c0_i32 = arith.constant 0 : i32
    %0 = arith.cmpi eq, %arg2, %c0_i32 : i32
    %1 = arith.extui %0 : i1 to i32
    %c0_i32_0 = arith.constant 0 : i32
    %2 = arith.cmpi ne, %1, %c0_i32_0 : i32
    scf.if %2 {
      %cst_16 = arith.constant 0xFF800000 : f32
      %34 = vector.broadcast %cst_16 : f32 to vector<1x128xf32>
      %c0_17 = arith.constant 0 : index
      %c0_18 = arith.constant 0 : index
      %35 = vector.load %arg7[%c0_17, %c0_18] : memref<1x128xf32, #tpu.memory_space<vmem>>, vector<1x128xf32>
      tpu.vector_store %arg7[%c0_17, %c0_18], %34 {strides = array<i32>} : memref<1x128xf32, #tpu.memory_space<vmem>>, vector<1x128xf32>,
    } else {
    }
    %c0 = arith.constant 0 : index
    %c0_1 = arith.constant 0 : index
    %c0_2 = arith.constant 0 : index
    %3 = vector.load %arg3[%c0, %c0_1, %c0_2] : memref<1x16x64xbf16, #tpu.memory_space<vmem>>, vector<1x16x64xbf16>
    %4 = vector.shape_cast %3 : vector<1x16x64xbf16> to vector<16x64xbf16>
    %c0_3 = arith.constant 0 : index
    %c0_4 = arith.constant 0 : index
    %5 = vector.load %arg4[%c0_3, %c0_4] : memref<64x256xbf16, #tpu.memory_space<vmem>>, vector<64x256xbf16>
    %cst = arith.constant dense<0.000000e+00> : vector<16x256xf32>
    %6 = tpu.matmul %4, %5, %cst {dimension_numbers = #tpu.dot_dimension_numbers<[1], [0], [0], [1], [0, 0, 1, 1], [], []>} : vector<16x64xbf16>, vector<64x256xbf16>, vector<16x256xf32> -> vector<16x256xf32>
    %c0_5 = arith.constant 0 : index
    %c0_6 = arith.constant 0 : index
    %7 = vector.load %arg5[%c0_5, %c0_6] : memref<1x256xf32, #tpu.memory_space<vmem>>, vector<1x256xf32>
    %8 = vector.broadcast %7 : vector<1x256xf32> to vector<16x256xf32>
    %9 = arith.addf %6, %8 : vector<16x256xf32>
    %10 = vector.extract_strided_slice %9 {offsets = [0, 0], sizes = [16, 128], strides = [1, 1]} : vector<16x256xf32> to vector<16x128xf32>
    %11 = vector.extract_strided_slice %9 {offsets = [0, 128], sizes = [16, 128], strides = [1, 1]} : vector<16x256xf32> to vector<16x128xf32>
    %cst_7 = arith.constant 0.000000e+00 : f32
    %12 = vector.broadcast %cst_7 : f32 to vector<16x128xf32>
    %13 = arith.subf %12, %11 : vector<16x128xf32>
    %14 = math.exp %13 : vector<16x128xf32>
    %cst_8 = arith.constant 1.000000e+00 : f32
    %15 = vector.broadcast %cst_8 : f32 to vector<16x128xf32>
    %16 = arith.addf %15, %14 : vector<16x128xf32>
    %17 = tpu.reciprocal %16 {approx = true} : vector<16x128xf32> -> vector<16x128xf32>
    %18 = arith.mulf %10, %17 : vector<16x128xf32>
    %cst_9 = arith.constant 0.000000e+00 : f32
    %19 = vector.broadcast %cst_9 : f32 to vector<16x128xf32>
    %20 = arith.maximumf %18, %19 : vector<16x128xf32>
    %c1_i32 = arith.constant 1 : i32
    %21 = arith.muli %arg0, %c1_i32 : i32
    %22 = arith.addi %21, %arg2 : i32
    %c16_i32 = arith.constant 16 : i32
    %23 = arith.muli %22, %c16_i32 : i32
    %c29_i32 = arith.constant 29 : i32
    %24 = arith.subi %c29_i32, %23 : i32
    %c16_i32_10 = arith.constant 16 : i32
    %25 = arith.cmpi sge, %24, %c16_i32_10 : i32
    %26 = arith.extui %25 : i1 to i32
    %c0_i32_11 = arith.constant 0 : i32
    %27 = arith.cmpi ne, %26, %c0_i32_11 : i32
    scf.if %27 {
      %c0_16 = arith.constant 0 : index
      %c0_17 = arith.constant 0 : index
      %34 = vector.load %arg7[%c0_16, %c0_17] : memref<1x128xf32, #tpu.memory_space<vmem>>, vector<1x128xf32>
      %cst_18 = arith.constant dense<0xFF800000> : vector<128xf32>
      %35 = vector.multi_reduction <maximumf>, %20, %cst_18 [0] : vector<16x128xf32> to vector<128xf32>
      %36 = vector.shape_cast %35 : vector<128xf32> to vector<1x128xf32>
      %37 = arith.maximumf %34, %36 : vector<1x128xf32>
      %c0_19 = arith.constant 0 : index
      %c0_20 = arith.constant 0 : index
      %38 = vector.load %arg7[%c0_19, %c0_20] : memref<1x128xf32, #tpu.memory_space<vmem>>, vector<1x128xf32>
      tpu.vector_store %arg7[%c0_19, %c0_20], %37 {strides = array<i32>} : memref<1x128xf32, #tpu.memory_space<vmem>>, vector<1x128xf32>,
    } else {
    }
    %c16_i32_12 = arith.constant 16 : i32
    %28 = arith.cmpi slt, %24, %c16_i32_12 : i32
    %29 = arith.extui %28 : i1 to i32
    %c0_i32_13 = arith.constant 0 : i32
    %30 = arith.cmpi ne, %29, %c0_i32_13 : i32
    scf.if %30 {
      %34 = tpu.iota {dimensions = array<i32: 0>} : vector<16x1xi32>
      %35 = vector.broadcast %24 : i32 to vector<16x1xi32>
      %36 = arith.cmpi slt, %34, %35 : vector<16x1xi32>
      %cst_16 = arith.constant 0xFF800000 : f32
      %37 = vector.shape_cast %36 : vector<16x1xi1> to vector<16x1xi1>
      %38 = vector.broadcast %37 : vector<16x1xi1> to vector<16x128xi1>
      %39 = vector.broadcast %cst_16 : f32 to vector<16x128xf32>
      %40 = arith.select %38, %20, %39 : vector<16x128xi1>, vector<16x128xf32>
      %c0_17 = arith.constant 0 : index
      %c0_18 = arith.constant 0 : index
      %41 = vector.load %arg7[%c0_17, %c0_18] : memref<1x128xf32, #tpu.memory_space<vmem>>, vector<1x128xf32>
      %cst_19 = arith.constant dense<0xFF800000> : vector<128xf32>
      %42 = vector.multi_reduction <maximumf>, %40, %cst_19 [0] : vector<16x128xf32> to vector<128xf32>
      %43 = vector.shape_cast %42 : vector<128xf32> to vector<1x128xf32>
      %44 = arith.maximumf %41, %43 : vector<1x128xf32>
      %c0_20 = arith.constant 0 : index
      %c0_21 = arith.constant 0 : index
      %45 = vector.load %arg7[%c0_20, %c0_21] : memref<1x128xf32, #tpu.memory_space<vmem>>, vector<1x128xf32>
      tpu.vector_store %arg7[%c0_20, %c0_21], %44 {strides = array<i32>} : memref<1x128xf32, #tpu.memory_space<vmem>>, vector<1x128xf32>,
    } else {
    }
    %c0_i32_14 = arith.constant 0 : i32
    %31 = arith.cmpi eq, %arg2, %c0_i32_14 : i32
    %32 = arith.extui %31 : i1 to i32
    %c0_i32_15 = arith.constant 0 : i32
    %33 = arith.cmpi ne, %32, %c0_i32_15 : i32
    scf.if %33 {
      %c0_16 = arith.constant 0 : index
      %c0_17 = arith.constant 0 : index
      %34 = vector.load %arg7[%c0_16, %c0_17] : memref<1x128xf32, #tpu.memory_space<vmem>>, vector<1x128xf32>
      %35 = vector.shape_cast %34 : vector<1x128xf32> to vector<1x1x1x128xf32>
      %36 = vector.shape_cast %35 : vector<1x1x1x128xf32> to vector<1x1x1x128xf32>
      %37 = vector.broadcast %36 : vector<1x1x1x128xf32> to vector<1x1x8x128xf32>
      %c0_18 = arith.constant 0 : index
      %c0_19 = arith.constant 0 : index
      %c0_20 = arith.constant 0 : index
      %c0_21 = arith.constant 0 : index
      %38 = vector.load %arg6[%c0_18, %c0_19, %c0_20, %c0_21] : memref<1x1x8x128xf32, #tpu.memory_space<vmem>>, vector<1x1x8x128xf32>
      tpu.vector_store %arg6[%c0_18, %c0_19, %c0_20, %c0_21], %37 {strides = array<i32>} : memref<1x1x8x128xf32, #tpu.memory_space<vmem>>, vector<1x1x8x128xf32>,
    } else {
    }
    return
  }
  func.func @transform_0(%arg0: i32, %arg1: i32, %arg2: i32) -> (i32, i32, i32) {
    %c1_i32 = arith.constant 1 : i32
    %0 = arith.muli %arg0, %c1_i32 : i32
    %1 = arith.addi %0, %arg2 : i32
    %c1_i32_0 = arith.constant 1 : i32
    %2 = arith.minsi %1, %c1_i32_0 : i32
    %c0_i32 = arith.constant 0 : i32
    %c0_i32_1 = arith.constant 0 : i32
    return %arg1, %2, %c0_i32 : i32, i32, i32
  }
  func.func @transform_1(%arg0: i32, %arg1: i32, %arg2: i32) -> (i32, i32) {
    %c0_i32 = arith.constant 0 : i32
    %c0_i32_0 = arith.constant 0 : i32
    %c0_i32_1 = arith.constant 0 : i32
    return %c0_i32, %c0_i32_0 : i32, i32
  }
  func.func @transform_2(%arg0: i32, %arg1: i32, %arg2: i32) -> (i32, i32) {
    %c0_i32 = arith.constant 0 : i32
    %c0_i32_0 = arith.constant 0 : i32
    %c0_i32_1 = arith.constant 0 : i32
    return %c0_i32, %c0_i32_0 : i32, i32
  }
  func.func @transform_3(%arg0: i32, %arg1: i32, %arg2: i32) -> (i32, i32, i32, i32) {
    %c0_i32 = arith.constant 0 : i32
    %c0_i32_0 = arith.constant 0 : i32
    %c0_i32_1 = arith.constant 0 : i32
    return %arg1, %arg0, %c0_i32, %c0_i32_0 : i32, i32, i32, i32
  }
}

</mosaic_0001>

<bundles_post_ra>
// kernel: malconv_forward.1
= control target key start
LH: loop header
LB: loop body
LE: loop exit
PB: predicated region body
PF: predicated region fallthrough
CT: control target
= control target key end

     0   :  { %s663_s12 = smov 0   ;;  %s665_s13 = smov 0   ;;  %s758_s0 = inlined_call_operand.vmem [shape: bf16[2,29,64], index: 0, kind: input, shape index: {}]   ;;  %s759_s1 = inlined_call_operand.vmem [shape: bf16[64,256], index: 1, kind: input, shape index: {}]   ;;  %s760_s2 = inlined_call_operand.vmem [shape: f32[1,256], index: 2, kind: input, shape index: {}]   ;;  %s761_s3 = inlined_call_operand.vmem [shape: f32[2,2,8,128], index: 3, kind: output, shape index: {}]  }
   0x1   :  { %s667_s14 = smov 0   ;;  %s669_s15 = smov 0  }
   0x2   :  { %s671_s16 = smov 0  }
   0x3 LB: > { %s28_s17 = sadd.s32 1, %s631_s14  ;;  %s32_s18 = sadd.s32 1, %s635_s15  ;;  %s639_s16 = sphi %s671_s16, %s13_s16   ;;  %s635_s15 = sphi %s669_s15, %s765_s15   ;;  %s631_s14 = sphi %s667_s14, %s764_s14   ;;  %s627_s13 = sphi %s665_s13, %s763_s13   ;;  %s623_s12 = sphi %s663_s12, %s762_s12  }
   0x4   : > { %p30_p0 = scmp.ge.s32.totalorder %s28_s17, 2  ;;  %p516_p1 = scmp.ge.s32.totalorder %s639_s16, 1 }
   0x5   : > { %p177_p2 = scmp.lt.s32.totalorder %s639_s16, 5 }
   0x6   : > { %s767_s17 = smov (%p30_p0, %s28_s17), 0  ;;  %s769_s18 = smov (!%p30_p0, %s32_s18), %s635_s15 }
   0x7   : > { %p178_p3 = pnand %p516_p1, %p177_p2  ;;  %p34_p4 = scmp.ge.s32.totalorder %s769_s18, 2 }
   0x8   : > { %p212_p5 = scmp.lt.s32.totalorder (!%p178_p3), %s627_s13, 1  ;;  %p215_p6 = scmp.lt.s32.totalorder (!%p178_p3), %s623_s12, 1 }
   0x9   : > { %s771_s18 = smov (%p34_p4, %s769_s18), 0  ;;  %181 = sbr.rel (%p178_p3) target bundleno = 323 (0x143), region = 32 }
   0xe   : > { %v580_v0 = vld [vmem:[%s759_s1 + $0x34] ss:$8 sps:$4 sm:$0xff]   ;;  %v641_v1 = vmov -inf   ;;  %v582_v2 = vld [vmem:[%s759_s1 + $0x30] ss:$8 sps:$4 sm:$0xff]   ;;  %v642_v3 = vmov 0   ;;  %v253_v11 = vlaneseq }
   0xf   : > { %240 = vst [vmem:[#allocation2] sm:$0x1] %v641_v1  ;;  %344 = vmatprep.mubr.bf16.mxu0 %v642_v3  ;;  %320 = vmatprep.subr.bf16.mxu0 %v580_v0  ;;  %v583_v4 = vld [vmem:[%s759_s1 + $0x24] ss:$8 sps:$4 sm:$0xff]   ;;  %v585_v5 = vld [vmem:[%s759_s1 + $0x20] ss:$8 sps:$4 sm:$0xff]  }
  0x10   : > { %321 = vmatpush1.bf16.msra.mxu0 %v582_v2  ;;  %s213_s27 = scalar_select %p212_p5, %s627_s13, 1  ;;  %v586_v6 = vld [vmem:[%s759_s1 + $0x14] ss:$8 sps:$4 sm:$0xff]   ;;  %v588_v7 = vld [vmem:[%s759_s1 + $0x10] ss:$8 sps:$4 sm:$0xff]   ;;  %vm308_vm0 = vcmask 523264  }
  0x11   : > { %322 = vmatprep.subr.bf16.mxu0 %v583_v4  ;;  %s773_s12 = smov (!%p215_p6, %s623_s12), 1  ;;  %v589_v8 = vld [vmem:[%s759_s1 + $0x4] ss:$8 sps:$4 sm:$0xff]   ;;  %v591_v9 = vld [vmem:[%s759_s1] ss:$8 sps:$4 sm:$0xff]   ;;  %v254_v12 = vshrl.u32 %v253_v11, 7 }
  0x12   : > { %s517_s30 = sshll.u32 %s213_s27, 1  ;;  %s518_s6 = sshll.u32 %s773_s12, 2  ;;  %v251_v14 = vld [vmem:[%s760_s2] sm:$0x3] }
  0x13   : > { %p217_p7 = scmp.lt.s32.totalorder %s517_s30, 3  ;;  %s520_s7 = sshll.u32 %s773_s12, 1  ;;  %v259_v13 = vsub.s32 1, %v254_v12  ;;  %v255_v30 = vsub.s32 0, %v254_v12 }
  0x14   : > { %323 = vmatpush1.bf16.msra.mxu0 %v585_v5  ;;  %s232_s10 = sadd.s32 %s520_s7, %s213_s27  ;;  %s532_s27 = sshll.u32 %s627_s13, 4 }
  0x15   : > { %324 = vmatprep.subr.bf16.mxu0 %v586_v6  ;;  %s775_s30 = smov (!%p217_p7, %s517_s30), 3  ;;  %s521_s19 = sshll.u32 %s232_s10, 3  ;;  %v260_v15 = vrot.slane %v251_v14, %v259_v13  ;;  %v256_v31 = vrot.slane %v251_v14, %v255_v30 }
  0x16   : > { %s220_s11 = sadd.s32 %s518_s6, %s775_s30  ;;  %s728_s12 = scalar_lea.vmem %s761_s3, %s521_s19 }
  0x17   : > { %s519_s22 = sshll.u32 %s220_s11, 2  ;;  %s734_s29 = ssub.s32 29, %s532_s27 }
  0x18   : > { %325 = vmatpush1.bf16.msra.mxu0 %v588_v7  ;;  %s222_s28 = scalar_lea.vmem %s758_s0, %s519_s22  ;;  %p533_p8 = scmp.lt.s32.totalorder %s734_s29, 16 }
  0x19   : > { %326 = vmatprep.subr.bf16.mxu0 %v589_v8  ;;  %v592_v10 = vld [vmem:[%s222_s28] sm:$0xff]  }
  0x1c   : > { %327 = vmatpush1.bf16.msra.mxu0 %v591_v9 }
  0x1f   : > { %531 = vmatmul.mubr.msk.bf16.vlgmr.msra.gmra.mxu0 %vm308_vm0, %v592_v10 }
  0xdf   : > { %v346_v16 = vpop.f32.mrf.mxu0 }
  0xe0   : > { %v347_v32 = vadd.f32 %v346_v16, %v256_v31 }
  0xe1   : > { %v348_v17 = vpop.f32.mrf.mxu0 }
  0xe2   : > { %v349_v18 = vadd.f32 %v348_v17, %v260_v15 }
  0xe3   : > { %v350_v19 = vpop.f32.mrf.mxu0 }
  0xe4   : > { %v355_v20 = vsub.f32 0.0, %v349_v18  ;;  %v351_v36 = vadd.f32 %v350_v19, %v256_v31 }
  0xe5   : > { %v352_v21 = vpop.f32.mrf.mxu0 }
  0xe6   : > { %v357_v22 = vmul.f32 1.442695, %v355_v20  ;;  %v353_v23 = vadd.f32 %v352_v21, %v260_v15 }
  0xe8   : > { %593 = vpow2.f32 %v357_v22  ;;  %v356_v24 = vsub.f32 0.0, %v353_v23 }
  0xea   : > { %v359_v25 = vmul.f32 1.442695, %v356_v24 }
  0xec   : > { %595 = vpow2.f32 %v359_v25 }
  0xf5   : > { %v594_v26 = vpop.eup %593 }
  0xf6   : > { %v361_v27 = vadd.f32 1.0, %v594_v26 }
  0xf8   : > { %597 = vrcp.f32 %v361_v27 }
  0xf9   : > { %v596_v28 = vpop.eup %595 }
  0xfa   : > { %v362_v29 = vadd.f32 1.0, %v596_v28 }
  0xfc   : > { %599 = vrcp.f32 %v362_v29 }
 0x105   : > { %v598_v33 = vpop.eup %597 }
 0x106   : > { %v365_v34 = vmul.f32 %v598_v33, %v347_v32 }
 0x108   : > { %v367_v35 = vmax.f32 %v365_v34, 0.0  ;;  %375 = sbr.rel (%p533_p8) target bundleno = 287 (0x11f), region = 40 }
 0x109   : > { %v600_v37 = vpop.eup %599 }
 0x10a   : > { %v366_v38 = vmul.f32 %v600_v37, %v351_v36 }
 0x10c   : > { %v368_v39 = vmax.f32 %v366_v38, 0.0 }
 0x10d   : > { %v376_v46 = vld [vmem:[#allocation2] sm:$0x1] }
 0x10e   : > { %v377_v40 = vmax.f32 %v367_v35, %v368_v39 }
 0x110   : > { %v378_v41 = vrot.slane %v377_v40, 4 }
 0x112   : > { %v379_v42 = vmax.f32 %v377_v40, %v378_v41 }
 0x114   : > { %v380_v43 = vrot.slane %v379_v42, 2 }
 0x116   : > { %v381_v44 = vmax.f32 %v379_v42, %v380_v43 }
 0x118   : > { %v382_v45 = vrot.slane %v381_v44, 1 }
 0x11a   : > { %v383_v47 = vmax.f32 %v381_v44, %v382_v45 }
 0x11c   : > { %v384_v48 = vmax.f32 %v376_v46, %v383_v47 }
 0x11e   : > { %385 = vst [vmem:[#allocation2] sm:$0x1] %v384_v48 }
 0x11f PF: > { %p534_p9 = scmp.ge.s32.totalorder %s734_s29, 16 }
 0x121   : > { %389 = sbr.rel (%p534_p9) target bundleno = 315 (0x13b), region = 44 }
 0x126   : > { %v392_v49 = vadd.s32 8, %v254_v12  ;;  %v393_v50 = vstv %s734_s29  ;;  %v402_v59 = vld [vmem:[#allocation2] sm:$0x1] }
 0x127   : > { %vm394_vm1 = vcmp.lt.s32.totalorder %v254_v12, %v393_v50 }
 0x128   : > { %vm395_vm2 = vcmp.lt.s32.totalorder %v392_v49, %v393_v50  ;;  %v400_v51 = vsel %vm394_vm1, %v367_v35, -inf }
 0x129   : > { %v401_v52 = vsel %vm395_vm2, %v368_v39, -inf }
 0x12a   : > { %v403_v53 = vmax.f32 %v400_v51, %v401_v52 }
 0x12c   : > { %v404_v54 = vrot.slane %v403_v53, 4 }
 0x12e   : > { %v405_v55 = vmax.f32 %v403_v53, %v404_v54 }
 0x130   : > { %v406_v56 = vrot.slane %v405_v55, 2 }
 0x132   : > { %v407_v57 = vmax.f32 %v405_v55, %v406_v56 }
 0x134   : > { %v408_v58 = vrot.slane %v407_v57, 1 }
 0x136   : > { %v409_v60 = vmax.f32 %v407_v57, %v408_v58 }
 0x138   : > { %v410_v61 = vmax.f32 %v402_v59, %v409_v60 }
 0x13a   : > { %411 = vst [vmem:[#allocation2] sm:$0x1] %v410_v61 }
 0x13b PF:  {}
 0x141   : > { %v535_v62 = vld [vmem:[#allocation2] ss:$0 sm:$0xff] }
 0x142   : > { %422 = vst [vmem:[%s728_s12] sm:$0xff] %v535_v62 }
 0x143 PF: > { %s13_s16 = sadd.s32 1, %s639_s16   ;;  %s762_s12 = smov %s631_s14 }
 0x144   : > { %p10_p10 = scmp.ge.s32.totalorder %s13_s16, 6   ;;  %s763_s13 = smov %s635_s15 }
 0x145   : > { %s764_s14 = smov %s767_s17  ;;  %s765_s15 = smov %s771_s18 }
 0x146   :  { %12 = sbr.rel (!%p10_p10) target bundleno = 3 (0x3), region = 78 }

</bundles_post_ra>
